<compile_context>
chip_gen: v5e
topology: v5e:2x2
jax: 0.10.0
libtpu: 0.0.40
codegen_flags: <defaults>
</compile_context>

<pallas_src>
from functools import partial

import numpy as np
import jax
import jax.numpy as jnp
from jax.experimental import pallas as pl
from jax.experimental.pallas import tpu as pltpu


# torchvision rgb_to_grayscale weights
_GRAY_WEIGHTS = (0.2989, 0.587, 0.114)


# ----------------------------------------------------------------------------
# Parameter construction (deterministic, shapes implied by metadata)
# ----------------------------------------------------------------------------
def _bilinear_matrix(out_size: int, in_size: int) -> np.ndarray:
    """Row-stochastic [out_size, in_size] bilinear interpolation matrix
    (align_corners=False half-pixel convention, as in torch F.interpolate)."""
    scale = in_size / out_size
    out_idx = np.arange(out_size, dtype=np.float64)
    src = (out_idx + 0.5) * scale - 0.5
    src = np.clip(src, 0.0, in_size - 1)
    lo = np.floor(src).astype(np.int64)
    hi = np.minimum(lo + 1, in_size - 1)
    frac = src - lo
    m = np.zeros((out_size, in_size), dtype=np.float32)
    m[np.arange(out_size), lo] += (1.0 - frac).astype(np.float32)
    m[np.arange(out_size), hi] += frac.astype(np.float32)
    return m


# ----------------------------------------------------------------------------
# Pallas kernel factory (statically specialized per metadata)
# ----------------------------------------------------------------------------
def _make_kernel(mode, order, skip_h, skip_w, c_in, c_out, compute_dtype):
    def kernel(x_ref, rh_ref, rw_ref, o_ref):
        tb, _, h_in, w_in = x_ref.shape
        th = rh_ref.shape[0]
        w_out = rw_ref.shape[0]

        x = x_ref[...]                                   # (TB, C_in, H_in, W_in)

        # --- channel adjustment, specialized statically ---------------------
        if mode == "gray":
            # grayscale FIRST (linear, commutes with resize): VPU weighted sum
            # in f32, shrinks all downstream matmul work by C_in x.
            xf = x.astype(jnp.float32)
            a = (_GRAY_WEIGHTS[0] * xf[:, 0]
                 + _GRAY_WEIGHTS[1] * xf[:, 1]
                 + _GRAY_WEIGHTS[2] * xf[:, 2])          # (TB, H_in, W_in)
            c_work = 1
        else:
            c_work = c_in
            # merge leading (batch, channel) dims only -> free reshape
            a = x.reshape(tb * c_work, h_in, w_in)

        # --- resize (MXU, compute_dtype inputs / f32 accumulation) ----------
        if skip_h and skip_w:
            y = a                                        # exact pass-through
        else:
            a = a.astype(compute_dtype)
            if order == "h_first":
                t = jnp.einsum("oh,bhw->bow", rh_ref[...], a,
                               preferred_element_type=jnp.float32)
                y = t if skip_w else jnp.einsum(
                    "pw,bow->bop", rw_ref[...], t.astype(compute_dtype),
                    preferred_element_type=jnp.float32)
            else:  # "w_first"
                r = jnp.einsum("pw,bhw->bhp", rw_ref[...], a,
                               preferred_element_type=jnp.float32)
                y = r if skip_h else jnp.einsum(
                    "oh,bhw->bow", rh_ref[...], r.astype(compute_dtype),
                    preferred_element_type=jnp.float32)

        # (TB*C_work, TH, W_out) -> (TB, C_work, TH, W_out): leading-dim split.
        y = y.reshape(tb, c_work, th, w_out).astype(o_ref.dtype)

        if mode == "pad":
            # zero-fill the extra channels directly; no matmul needed.
            # (channel axis is a leading dim, so both stores are unmasked.)
            o_ref[:, :c_in, :, :] = y
            o_ref[:, c_in:, :, :] = jnp.zeros(
                (tb, c_out - c_in, th, w_out), dtype=o_ref.dtype)
        else:
            o_ref[...] = y

    return kernel


# ----------------------------------------------------------------------------
# Wrapper: static specialization, tile selection, pallas_call plumbing
# ----------------------------------------------------------------------------
def image_preprocessing(x: jax.Array, metadata: dict, *,
                        compute_dtype=jnp.bfloat16,
                        vmem_budget_bytes: int = 8 * 1024 * 1024) -> jax.Array:
    """Pallas equivalent of _ImagePreprocessing.forward for a stacked NCHW tensor."""
    assert x.ndim == 4, "expected stacked images [B, C, H, W]"
    b, c_in, h_in, w_in = x.shape
    prep = metadata["preprocessing"]
    h_out, w_out, c_out = prep["height"], prep["width"], prep["num_channels"]
    resize_method = prep["resize_method"]
    assert resize_method == "interpolate", \
        "only the 'interpolate' resize method is implemented"

    # --- static specialization of the channel adjustment --------------------
    if c_out == c_in:
        mode = "identity"
    elif c_out == 1:
        if c_in != 3:
            raise ValueError("grayscale conversion requires 3 input channels")
        mode = "gray"
    elif c_in < c_out:
        mode = "pad"
    else:
        raise ValueError(
            f"Number of channels cannot be reconciled. metadata.num_channels = {c_out}, "
            f"but imgs.shape[1] = {c_in}")
    c_work = 1 if mode == "gray" else c_in

    skip_h = (h_in == h_out)
    skip_w = (w_in == w_out)

    # --- tile selection (TB images per step, optional TH tiling of H_out) ---
    cd_size = jnp.dtype(compute_dtype).itemsize
    in_size = x.dtype.itemsize
    out_size = in_size

    def footprint(tb, th):
        x_blk = tb * c_in * h_in * w_in * in_size
        o_blk = tb * c_out * th * w_out * out_size
        mats = (th * h_in + w_out * w_in) * cd_size
        inter = (tb * c_work
                 * (h_in * w_in + th * w_in + h_in * w_out + th * w_out)
                 * (4 + cd_size))
        return 2 * (x_blk + o_blk + mats) + inter         # 2x: double buffering

    # TH: only needed when the full-H block would blow the VMEM budget.
    th = h_out
    if (not skip_h) and footprint(1, h_out) > vmem_budget_bytes:
        cands = [d for d in range(8, h_out, 8) if h_out % d == 0]
        for cand in sorted(cands, reverse=True):
            if footprint(1, cand) <= vmem_budget_bytes:
                th = cand
                break
        else:
            if cands:
                th = min(cands)

    # TB: biggest divisor of B that still fits (amortizes per-step overhead).
    tb = 1
    for cand in range(1, b + 1):
        if b % cand == 0 and footprint(cand, th) <= vmem_budget_bytes:
            tb = cand
    # keep >= 2 grid steps when possible so the "parallel" axes can be split
    # across TensorCores (v7x megacore); ~free on single-core v5e/v6e.
    if b > 1 and (b // tb) * (h_out // th) < 2:
        tb = max(1, tb // 2)
        while b % tb != 0:
            tb -= 1

    nb, nh = b // tb, h_out // th

    # --- resize-order selection (the two separable resizes commute) ---------
    if skip_h and skip_w:
        order = "h_first"          # unused
    elif skip_h:
        order = "w_first"
    elif skip_w:
        order = "h_first"
    elif nh > 1:
        order = "h_first"          # H_out tiling only composes with H-first
    else:
        cost_h_first = h_out * w_in * (h_in + w_out)      # per image-channel
        cost_w_first = h_in * w_out * (w_in + h_out)
        order = "h_first" if cost_h_first <= cost_w_first else "w_first"

    # resize matrices, pre-cast to the MXU compute dtype (no in-kernel cast)
    rh = jnp.asarray(_bilinear_matrix(h_out, h_in), dtype=compute_dtype)
    rw = jnp.asarray(_bilinear_matrix(w_out, w_in), dtype=compute_dtype)

    # size the scoped VMEM limit from the real footprint; cap below v7x's 64 MiB
    vmem_limit = int(min(max(footprint(tb, th) + (4 << 20), 32 << 20), 56 << 20))

    kernel = _make_kernel(mode, order, skip_h, skip_w, c_in, c_out, compute_dtype)
    out_shape = jax.ShapeDtypeStruct((b, c_out, h_out, w_out), x.dtype)

    return pl.pallas_call(
        kernel,
        out_shape=out_shape,
        grid_spec=pltpu.PrefetchScalarGridSpec(
            num_scalar_prefetch=0,
            grid=(nb, nh),
            in_specs=[
                pl.BlockSpec((tb, c_in, h_in, w_in), lambda i, j: (i, 0, 0, 0)),
                pl.BlockSpec((th, h_in), lambda i, j: (j, 0)),
                pl.BlockSpec((w_out, w_in), lambda i, j: (0, 0)),
            ],
            out_specs=pl.BlockSpec((tb, c_out, th, w_out),
                                   lambda i, j: (i, 0, j, 0)),
        ),
        compiler_params=pltpu.CompilerParams(
            # every (i, j) tile is fully independent -> both axes are parallel
            dimension_semantics=("parallel", "parallel"),
            vmem_limit_bytes=vmem_limit),
    )(x, rh, rw)


# ----------------------------------------------------------------------------
# Self-test
# ----------------------------------------------------------------------------
if __name__ == "__main__":
    key = jax.random.PRNGKey(0)
    x = jax.random.uniform(key, (2, 3, 16, 16), dtype=jnp.float32)

    def reference(x, h_out, w_out, c_out):
        """f32 reference in the original module order: resize, then channel mix."""
        rh = jnp.asarray(_bilinear_matrix(h_out, x.shape[2]))
        rw = jnp.asarray(_bilinear_matrix(w_out, x.shape[3]))
        r = jnp.einsum("oh,bchw->bcow", rh, x)
        r = jnp.einsum("pw,bcow->bcop", rw, r)
        c_in = x.shape[1]
        if c_out == c_in:
            return r
        if c_out == 1:
            w = jnp.asarray(_GRAY_WEIGHTS, dtype=jnp.float32)
            return jnp.einsum("c,bchw->bhw", w, r)[:, None]
        return jnp.pad(r, ((0, 0), (0, c_out - c_in), (0, 0), (0, 0)))

    # Case 1: resize 16x16 -> 8x8 and convert RGB -> grayscale (num_channels=1).
    md_gray = {"preprocessing": {"height": 8, "width": 8, "num_channels": 1,
                                 "resize_method": "interpolate"}}
    out_gray = jax.block_until_ready(image_preprocessing(x, md_gray))
    assert out_gray.shape == (2, 1, 8, 8)
    assert bool(jnp.all(jnp.isfinite(out_gray)))
    assert bool(jnp.all(jnp.abs(out_gray - reference(x, 8, 8, 1)) < 5e-2))

    # Case 2: resize 16x16 -> 8x8 and zero-pad channels 3 -> 4.
    md_pad = {"preprocessing": {"height": 8, "width": 8, "num_channels": 4,
                                "resize_method": "interpolate"}}
    out_pad = jax.block_until_ready(image_preprocessing(x, md_pad))
    assert out_pad.shape == (2, 4, 8, 8)
    assert bool(jnp.all(out_pad[:, 3] == 0.0))         # padded channel exactly zero
    assert bool(jnp.all(jnp.abs(out_pad - reference(x, 8, 8, 4)) < 5e-2))

    # Case 3: no resize, identity channels -> exact pass-through.
    md_id = {"preprocessing": {"height": 16, "width": 16, "num_channels": 3,
                               "resize_method": "interpolate"}}
    out_id = jax.block_until_ready(image_preprocessing(x, md_id))
    assert out_id.shape == x.shape
    assert bool(jnp.all(out_id == x))

    # Case 4: upscale 16x16 -> 24x20, identity channels (both resize passes).
    md_up = {"preprocessing": {"height": 24, "width": 20, "num_channels": 3,
                               "resize_method": "interpolate"}}
    out_up = jax.block_until_ready(image_preprocessing(x, md_up))
    assert out_up.shape == (2, 3, 24, 20)
    assert bool(jnp.all(jnp.abs(out_up - reference(x, 24, 20, 3)) < 5e-2))

    print("KERNEL_OK")
</pallas_src>

<mosaic_0001>
module attributes {stable_mosaic.version = 11 : i64} {
  func.func @kernel(%arg0: i32, %arg1: i32, %arg2: memref<1x3x16x16xf32, #tpu.memory_space<vmem>>, %arg3: memref<8x16xbf16, #tpu.memory_space<vmem>>, %arg4: memref<8x16xbf16, #tpu.memory_space<vmem>>, %arg5: memref<1x1x8x8xf32, #tpu.memory_space<vmem>>) attributes {dimension_semantics = [#tpu.dimension_semantics<parallel>, #tpu.dimension_semantics<parallel>], iteration_bounds = array<i64: 2, 1>, scalar_prefetch = 0 : i64, scratch_operands = 0 : i64, tpu.core_type = #tpu.core_type<tc>, window_params = [{transform_indices = @transform_0, window_bounds = array<i64: 1, 3, 16, 16>}, {transform_indices = @transform_1, window_bounds = array<i64: 8, 16>}, {pipeline_mode = #tpu.pipeline_mode<synchronous>, transform_indices = @transform_2, window_bounds = array<i64: 8, 16>}, {transform_indices = @transform_3, window_bounds = array<i64: 1, 1, 8, 8>}]} {
    %c0 = arith.constant 0 : index
    %c0_0 = arith.constant 0 : index
    %c0_1 = arith.constant 0 : index
    %c0_2 = arith.constant 0 : index
    %0 = vector.load %arg2[%c0, %c0_0, %c0_1, %c0_2] : memref<1x3x16x16xf32, #tpu.memory_space<vmem>>, vector<1x3x16x16xf32>
    %1 = vector.extract_strided_slice %0 {offsets = [0, 0, 0, 0], sizes = [1, 1, 16, 16], strides = [1, 1, 1, 1]} : vector<1x3x16x16xf32> to vector<1x1x16x16xf32>
    %2 = vector.shape_cast %1 : vector<1x1x16x16xf32> to vector<1x16x16xf32>
    %cst = arith.constant 2.989000e-01 : f32
    %3 = vector.broadcast %cst : f32 to vector<1x16x16xf32>
    %4 = arith.mulf %3, %2 : vector<1x16x16xf32>
    %5 = vector.extract_strided_slice %0 {offsets = [0, 1, 0, 0], sizes = [1, 1, 16, 16], strides = [1, 1, 1, 1]} : vector<1x3x16x16xf32> to vector<1x1x16x16xf32>
    %6 = vector.shape_cast %5 : vector<1x1x16x16xf32> to vector<1x16x16xf32>
    %cst_3 = arith.constant 5.870000e-01 : f32
    %7 = vector.broadcast %cst_3 : f32 to vector<1x16x16xf32>
    %8 = arith.mulf %7, %6 : vector<1x16x16xf32>
    %9 = arith.addf %4, %8 : vector<1x16x16xf32>
    %10 = vector.extract_strided_slice %0 {offsets = [0, 2, 0, 0], sizes = [1, 1, 16, 16], strides = [1, 1, 1, 1]} : vector<1x3x16x16xf32> to vector<1x1x16x16xf32>
    %11 = vector.shape_cast %10 : vector<1x1x16x16xf32> to vector<1x16x16xf32>
    %cst_4 = arith.constant 1.140000e-01 : f32
    %12 = vector.broadcast %cst_4 : f32 to vector<1x16x16xf32>
    %13 = arith.mulf %12, %11 : vector<1x16x16xf32>
    %14 = arith.addf %9, %13 : vector<1x16x16xf32>
    %15 = arith.truncf %14 : vector<1x16x16xf32> to vector<1x16x16xbf16>
    %c0_5 = arith.constant 0 : index
    %c0_6 = arith.constant 0 : index
    %16 = vector.load %arg3[%c0_5, %c0_6] : memref<8x16xbf16, #tpu.memory_space<vmem>>, vector<8x16xbf16>
    "tpu.trace_start"() <{level = 10 : i32, message = "oh,bhw->bow"}> : () -> ()
    %cst_7 = arith.constant dense<0.000000e+00> : vector<1x16x8xf32>
    %17 = tpu.matmul %15, %16, %cst_7 {dimension_numbers = #tpu.dot_dimension_numbers<[1], [1], [0, 2], [0], [0, 0, 0, 2, 1, 0], [], []>} : vector<1x16x16xbf16>, vector<8x16xbf16>, vector<1x16x8xf32> -> vector<1x16x8xf32>
    %18 = tpu.transpose %17, [0, 2, 1] : vector<1x16x8xf32> -> vector<1x8x16xf32>
    "tpu.trace_stop"() : () -> ()
    %c0_8 = arith.constant 0 : index
    %c0_9 = arith.constant 0 : index
    %19 = vector.load %arg4[%c0_8, %c0_9] : memref<8x16xbf16, #tpu.memory_space<vmem>>, vector<8x16xbf16>
    %20 = arith.truncf %18 : vector<1x8x16xf32> to vector<1x8x16xbf16>
    "tpu.trace_start"() <{level = 10 : i32, message = "pw,bow->bop"}> : () -> ()
    %cst_10 = arith.constant dense<0.000000e+00> : vector<1x8x8xf32>
    %21 = tpu.matmul %20, %19, %cst_10 {dimension_numbers = #tpu.dot_dimension_numbers<[2], [1], [0, 1], [0], [0, 0, 0, 1, 1, 0], [], []>} : vector<1x8x16xbf16>, vector<8x16xbf16>, vector<1x8x8xf32> -> vector<1x8x8xf32>
    "tpu.trace_stop"() : () -> ()
    %22 = vector.shape_cast %21 : vector<1x8x8xf32> to vector<1x1x8x8xf32>
    %c0_11 = arith.constant 0 : index
    %c0_12 = arith.constant 0 : index
    %c0_13 = arith.constant 0 : index
    %c0_14 = arith.constant 0 : index
    %23 = vector.load %arg5[%c0_11, %c0_12, %c0_13, %c0_14] : memref<1x1x8x8xf32, #tpu.memory_space<vmem>>, vector<1x1x8x8xf32>
    tpu.vector_store %arg5[%c0_11, %c0_12, %c0_13, %c0_14], %22 {strides = array<i32>} : memref<1x1x8x8xf32, #tpu.memory_space<vmem>>, vector<1x1x8x8xf32>,
    return
  }
  func.func @transform_0(%arg0: i32, %arg1: i32) -> (i32, i32, i32, i32) {
    %c0_i32 = arith.constant 0 : i32
    %c0_i32_0 = arith.constant 0 : i32
    %c0_i32_1 = arith.constant 0 : i32
    %c0_i32_2 = arith.constant 0 : i32
    return %arg0, %c0_i32, %c0_i32_0, %c0_i32_1 : i32, i32, i32, i32
  }
  func.func @transform_1(%arg0: i32, %arg1: i32) -> (i32, i32) {
    %c0_i32 = arith.constant 0 : i32
    %c0_i32_0 = arith.constant 0 : i32
    return %arg1, %c0_i32 : i32, i32
  }
  func.func @transform_2(%arg0: i32, %arg1: i32) -> (i32, i32) {
    %c0_i32 = arith.constant 0 : i32
    %c0_i32_0 = arith.constant 0 : i32
    %c0_i32_1 = arith.constant 0 : i32
    return %c0_i32, %c0_i32_0 : i32, i32
  }
  func.func @transform_3(%arg0: i32, %arg1: i32) -> (i32, i32, i32, i32) {
    %c0_i32 = arith.constant 0 : i32
    %c0_i32_0 = arith.constant 0 : i32
    %c0_i32_1 = arith.constant 0 : i32
    return %arg0, %c0_i32, %arg1, %c0_i32_0 : i32, i32, i32, i32
  }
}

</mosaic_0001>

<bundles_post_ra>
// kernel: tpu_custom_call.1
= control target key start
LH: loop header
LB: loop body
LE: loop exit
PB: predicated region body
PF: predicated region fallthrough
CT: control target
= control target key end

     0   :  { %s937_s0 = inlined_call_operand.hbm [shape: f32[2,3,16,16], index: 0, kind: input, shape index: {}]   ;;  %s938_s1 = inlined_call_operand.hbm [shape: bf16[8,16], index: 1, kind: input, shape index: {}]   ;;  %s939_s2 = inlined_call_operand.hbm [shape: bf16[8,16], index: 2, kind: input, shape index: {}]   ;;  %s940_s3 = inlined_call_operand.hbm [shape: f32[2,1,8,8], index: 3, kind: output, shape index: {}]  }
   0x1   :  { %941 = sst [smem:[#allocation12_spill]] %s938_s1 }
   0x2   :  { %8 = vsyncpa [#allocation3], 0 }
   0x3   :  { %10 = vsyncpa [#allocation3 + $0x1], 0 }
   0x4   :  { %11 = vsyncpa [#allocation6], 0 }
   0x5   :  { %12 = vsyncpa [#allocation4], 0 }
   0x6   :  { %14 = vsyncpa [#allocation4 + $0x1], 0  ;;  %s778_s12 = smov 0   ;;  %s780_s13 = smov 0  }
   0x7   :  { %s782_s14 = smov 0   ;;  %s784_s15 = smov 0  }
   0x8   :  { %s786_s16 = smov 0   ;;  %s788_s17 = smov 0  }
   0x9 LB: > { %s469_s18 = sadd.s32 4294967295, %s752_s17   ;;  %s470_s19 = sadd.s32 4294967294, %s752_s17   ;;  %s752_s17 = sphi %s788_s17, %s20_s17   ;;  %s748_s16 = sphi %s786_s16, %s954_s16   ;;  %s744_s15 = sphi %s784_s15, %s953_s15   ;;  %s740_s14 = sphi %s782_s14, %s952_s14   ;;  %s736_s13 = sphi %s780_s13, %s951_s13   ;;  %s732_s12 = sphi %s778_s12, %s950_s12  }
   0xa   : > { %s39_s20 = sadd.s32 1, %s740_s14  ;;  %p46_p0 = scmp.ne.s32.totalorder %s740_s14, %s736_s13 }
   0xb   : > { %p47_p1 = scmp.eq.s32.totalorder %s752_s17, 0  ;;  %p52_p2 = scmp.ne.s32.totalorder %s736_s13, %s732_s12 }
   0xc   : > { %p816_p3 = scmp.eq.s32.totalorder %s469_s18, 0  ;;  %p125_p4 = scmp.eq.s32.totalorder %s469_s18, 1 }
   0xd   : > { %p820_p5 = por %p47_p1, %p46_p0  ;;  %p131_p6 = scmp.eq.s32.totalorder %s470_s19, 1 }
   0xe   : > { %p826_p7 = por %p816_p3, %p52_p2  ;;  %p830_p8 = por %p125_p4, %p46_p0 }
   0xf   : > { %p834_p9 = por %p131_p6, %p52_p2  ;;  %p471_p10 = scmp.ge.s32.totalorder %s752_s17, 1 }
  0x10   : > { %p138_p11 = scmp.lt.s32.totalorder %s752_s17, 3  ;;  %s947_s1 = sld [smem:[#allocation12_spill]] }
  0x11   : > { %s754_s30 = smov [#allocation5]   ;;  %p474_p13 = scmp.ge.s32.totalorder %s752_s17, 2 }
  0x12   : > { %p843_p12 = pnand %p471_p10, %p138_p11  ;;  %s154_s4 = sshll.u32 %s754_s30, 4  ;;  %s155_s4 = int_to_ptr.vmem [resolvable:$true] %s154_s4 }
  0x13   : > { %p518_p1 = scmp.lt.s32.totalorder %s752_s17, 2  ;;  %s164_s7 = sshll.u32 %s939_s2, 4  ;;  %s165_s7 = int_to_ptr.hbm [resolvable:$true] %s164_s7 }
  0x14   : > { %p501_p0 = pneg %p843_p12  ;;  %s755_s9 = smov [#allocation7]  }
  0x15   : > { %p858_p4 = pnand %p518_p1, %p820_p5  ;;  %s166_s10 = sshll.u32 %s755_s9, 4  ;;  %s167_s10 = int_to_ptr.vmem [resolvable:$true] %s166_s10 }
  0x16   : > { %s152_s28 = sshll.u32 %s947_s1, 4  ;;  %p502_p2 = pnand %p501_p0, %p816_p3  ;;  %s153_s28 = int_to_ptr.hbm [resolvable:$true] %s152_s28 }
  0x17   : > { %s177_s11 = sand.u32 1, %s740_s14   ;;  %s32_s18 = sadd.s32 1, %s748_s16 }
  0x18   : > { %504 = dma.hbm_to_vmem [thread:$0]  (!%p502_p2), %s153_s28, 64, %s155_s4, [#allocation6]  }
  0x19   : > { %507 = dma.hbm_to_vmem [thread:$0]  (!%p502_p2), %s165_s7, 64, %s167_s10, [#allocation6]  }
  0x1a   : > { %s486_s19 = smul.u32 48, %s177_s11  ;;  %p34_p6 = scmp.ge.s32.totalorder %s32_s18, 2 }
  0x1b   : > { %s487_s26 = smul.u32 48, %s748_s16  ;;  %s178_s9 = scalar_lea.sflag [#allocation3], %s177_s11 }
  0x1c   : > { %s956_s18 = smov (%p34_p6, %s32_s18), 0  ;;  %s181_s5 = scalar_lea.vmem [#allocation2], %s486_s19 }
  0x1d   : > { %s186_s30 = scalar_lea.hbm %s937_s0, %s487_s26  ;;  %s189_s6 = sshll.u32 %s181_s5, 4  ;;  %s190_s6 = int_to_ptr.vmem [resolvable:$true] %s189_s6 }
  0x1e   : > { %s36_s28 = ssub.s32 %s748_s16, %s956_s18  ;;  %s187_s4 = sshll.u32 %s186_s30, 4  ;;  %s188_s4 = int_to_ptr.hbm [resolvable:$true] %s187_s4 }
  0x1f   : > { %p37_p5 = scmp.eq.s32.totalorder %s36_s28, 0  ;;  %s756_s10 = smov 128  }
  0x20   : > { %s757_s1 = smov 8   ;;  %201 = sbr.rel (%p843_p12) target bundleno = 653 (0x28d), region = 32 }
  0x21   : > { %s875_s7 = scalar_select %p37_p5, %s740_s14, %s39_s20  }
  0x22   : > { %511 = dma.hbm_to_vmem [thread:$0]  (!%p858_p4), %s188_s4, 768, %s190_s6, %s178_s9, %s756_s10, %s756_s10, %s757_s1  }
  0x23   : > { %s882_s19 = sand.u32 (!%p843_p12), 1, %s736_s13  }
  0x24   : > { %s488_s26 = smul.u32 (!%p843_p12), 48, %s882_s19  ;;  %s204_s22 = scalar_lea.sflag (!%p843_p12), [#allocation3], %s882_s19 }
  0x26   : > { %s207_s27 = scalar_lea.vmem [#allocation2], %s488_s26 }
  0x27   : > { %719 = dma.done.wait (%p826_p7), %s204_s22, 768  }
  0x28   : > { %721 = vsyncadd (%p826_p7), %s204_s22, 4294966528 }
  0x29   : > { %723 = dma.done.wait (%p816_p3), [#allocation6], 128  }
  0x2a   : > { %725 = vsyncadd (%p816_p3), [#allocation6], 4294967168  ;;  %v242_v0 = vld [vmem:[%s207_s27] sm:$0xff]  ;;  %v243_v1 = vld [vmem:[%s207_s27 + $0x8] sm:$0xff]  ;;  %vm276_vm0 = vcmask 130048   ;;  %s483_s1 = sshll.u32 %s744_s15, 3 }
  0x2b   : > { %v244_v2 = vld [vmem:[%s207_s27 + $0x10] sm:$0xff]  ;;  %v245_v3 = vld [vmem:[%s207_s27 + $0x18] sm:$0xff]  ;;  %v246_v4 = vld [vmem:[%s207_s27 + $0x20] sm:$0xff]  ;;  %v248_v6 = vmul.f32 0.2989, %v242_v0  ;;  %s479_s20 = sshll.u32 %s882_s19, 3  ;;  %s364_s29 = scalar_lea.hbm %s940_s3, %s483_s1 }
  0x2c   : > { %v247_v5 = vld [vmem:[%s207_s27 + $0x28] sm:$0xff]  ;;  %v249_v7 = vmul.f32 0.2989, %v243_v1  ;;  %v250_v8 = vmul.f32 0.587, %v244_v2  ;;  %s240_s8 = scalar_lea.vmem [#allocation8], %s479_s20 }
  0x2d   : > { %v251_v9 = vmul.f32 0.587, %v245_v3  ;;  %v254_v10 = vmul.f32 0.114, %v246_v4  ;;  %v255_v11 = vmul.f32 0.114, %v247_v5 }
  0x2e   : > { %v259_v12 = vld [vmem:[#allocation5] sm:$0xf]  ;;  %v252_v13 = vadd.f32 %v250_v8, %v248_v6  ;;  %v329_v20 = vld [vmem:[#allocation7] sm:$0xf]  ;;  %s366_s11 = sshll.u32 %s240_s8, 4  ;;  %s368_s30 = sshll.u32 %s364_s29, 4  ;;  %s367_s11 = int_to_ptr.vmem [resolvable:$true] %s366_s11  ;;  %s369_s30 = int_to_ptr.hbm [resolvable:$true] %s368_s30 }
  0x2f   : > { %v253_v14 = vadd.f32 %v251_v9, %v249_v7  ;;  %v281_v15 = vsel %vm276_vm0, %v259_v12, 0  ;;  %v335_v21 = vsel %vm276_vm0, %v329_v20, 0  ;;  %vm350_vm1 = vcmask 64512   ;;  %s353_s5 = scalar_lea.sflag [#allocation4], %s882_s19  ;;  %s680_s6 = sshra.s32 %s369_s30, 4  ;;  %s681_s6 = int_to_ptr.hbm [resolvable:$true] %s680_s6 }
  0x30   : > { %290 = vmatpush.bf16.xpose.msra.mxu0 %v281_v15  ;;  %v256_v16 = vadd.f32 %v254_v10, %v252_v13  ;;  %344 = vmatpush.bf16.xpose.msra.mxu1 %v335_v21  ;;  %s682_s28 = scalar_lea.hbm %s681_s6, 8  ;;  %s686_s9 = scalar_lea.hbm %s940_s3, 16 }
  0x31   : > { %v257_v17 = vadd.f32 %v255_v11, %v253_v14  ;;  %p683_p3 = scmp.ne.s32.totalorder %s681_s6, %s682_s28  ;;  %p687_p11 = scmp.lt.s32.totalorder %s681_s6, %s940_s3 }
  0x32   : > { %p688_p12 = scmp.lt.s32.totalorder %s686_s9, %s682_s28 }
  0x33   : > { %v258_v18 = vpack.c.bf16 %v257_v17, %v256_v16  ;;  %p684_p7 = pnand %p683_p3, %p830_p8 }
  0x34   : > { %p689_p0 = por %p688_p12, %p687_p11 }
  0x35   : > { %260 = vxpose.xlu0.c.b16.start.end [1/1] (short) (narrow) %v258_v18, 16  ;;  %p685_p10 = pneg %p684_p7 }
  0x37   : > { %p690_p1 = pnand %p689_p0, %p685_p10 }
  0xe1   : > { %v268_v19 = vpop.trf.xlu0 }
  0xe2   : > { %480 = vmatmul.msk.bf16.vlgmr.msra.gmra.mxu0 %vm276_vm0, %v268_v19 }
 0x15f   : > { %v292_v22 = vpop.f32.mrf.mxu0 }
 0x160   : > { %297 = vxpose.xlu0.b32.start [1/2] (short) (narrow) %v292_v22, 8 }
 0x167   : > { %v294_v23 = vpop.f32.mrf.mxu0 }
 0x168   : > { %298 = vxpose.xlu0.b32.end [2/2] (short) (narrow) %v294_v23, 8 }
 0x204   : > { %v313_v24 = vpop.trf.xlu0 }
 0x205   : > { %v330_v25 = vpack.c.bf16 %v313_v24, %v313_v24 }
 0x207   : > { %481 = vmatmul.msk.bf16.vlgmr.msra.gmra.mxu1 %vm276_vm0, %v330_v25 }
 0x284   : > { %v346_v26 = vpop.f32.mrf.mxu1 }
 0x285   : > { %351 = vst.msk [vmem:[%s240_s8] sm:$0xff] %vm350_vm1, %v346_v26 }
 0x286   : > { %693 = shalt.err (!%p690_p1)
}
 0x287   : > { %499 = dma.vmem_to_hbm [thread:$0]  (%p830_p8), %s367_s11, 128, %s369_s30, %s353_s5  }
 0x28c   : > { %v348_v27 = vpop.f32.mrf.mxu1 }
 0x28d PF: > { %s380_s19 = sand.u32 1, %s732_s12   ;;  %p513_p2 = pnand %p474_p13, %p834_p9 }
 0x28e   : > { %s381_s22 = scalar_lea.sflag [#allocation4], %s380_s19 }
 0x28f   : > { %p514_p4 = pneg %p513_p2 }
 0x291   : > { %727 = dma.done.wait (%p514_p4), %s381_s22, 128  }
 0x292   : > { %729 = vsyncadd (%p514_p4), %s381_s22, 4294967168  ;;  %s20_s17 = sadd.s32 1, %s752_s17   ;;  %s950_s12 = smov %s736_s13 }
 0x293   : > { %p17_p6 = scmp.ge.s32.totalorder %s20_s17, 4   ;;  %s951_s13 = smov %s740_s14 }
 0x294   : > { %s952_s14 = smov %s875_s7  ;;  %s953_s15 = smov %s748_s16 }
 0x295   : > { %s954_s16 = smov %s956_s18  ;;  %19 = sbr.rel (!%p17_p6) target bundleno = 9 (0x9), region = 86 }
 0x29a   :  { %387 = vsyncpa [#allocation3], 1 }
 0x29b   :  { %389 = vsyncpa [#allocation3 + $0x1], 1 }
 0x29c   :  { %390 = vsyncpa [#allocation6], 1 }
 0x29d   :  { %391 = vsyncpa [#allocation4], 1 }
 0x29e   :  { %393 = vsyncpa [#allocation4 + $0x1], 1 }

</bundles_post_ra>
